<compile_context>
chip_gen: v5e
topology: v5e:2x2
jax: 0.10.0
libtpu: 0.0.40
codegen_flags: <defaults>
</compile_context>

<pallas_src>
import jax
import jax.numpy as jnp
from jax.experimental import pallas as pl
from jax.experimental.pallas import tpu as pltpu


def _round_up(x, m):
    return ((x + m - 1) // m) * m


def _make_mlp_kernel(num_hidden: int, use_dropout: bool):
    """kernel(x_ref, [W_i, b_i, (mask_i)] * num_hidden, W_tail, b_tail, o_ref)."""

    def kernel(x_ref, *refs):
        o_ref = refs[-1]
        params = refs[:-1]

        h = x_ref[...].astype(jnp.float32)

        idx = 0
        for _ in range(num_hidden):
            w = params[idx][...]
            b = params[idx + 1][...]
            h = jnp.dot(h, w, preferred_element_type=jnp.float32) + b
            # LeakyReLU(negative_slope=0.2): mul + max (no select mask).
            h = jnp.maximum(h, 0.2 * h)
            if use_dropout:
                # Pre-scaled inverted-dropout mask {0, 1/(1-p)}: one multiply.
                h = h * params[idx + 2][...]
                idx += 3
            else:
                idx += 2

        wt = params[idx][...]
        bt = params[idx + 1][...]
        out = jnp.dot(h, wt, preferred_element_type=jnp.float32) + bt  # [TB, 2]

        # Softplus on column 1 only (PyTorch threshold-20 clamp), selected with
        # a column iota so everything stays in-register and is stored once.
        sp = jnp.where(out > 20.0, out,
                       jnp.log1p(jnp.exp(jnp.minimum(out, 20.0))))
        col = jax.lax.broadcasted_iota(jnp.int32, out.shape, 1)
        o_ref[...] = jnp.where(col == 0, out, sp).astype(o_ref.dtype)

    return kernel


def mc_dropnet_forward(x, weights, biases, drop_rate, key, *, block_b=512):
    """Run the MC_dropnet forward pass in one Pallas call.

    x:       [B, n_input] float32
    weights: list of [in, out] float32 (hidden layers ... then tail)
    biases:  list of [1, out] float32
    key:     jax PRNG key used for the MC-dropout masks
    """
    assert x.ndim == 2
    num_hidden = len(weights) - 1
    B, n_input = x.shape
    n_output = weights[-1].shape[1]
    assert n_output == 2
    use_dropout = float(drop_rate) > 0.0001

    # Batch tile: multiple of the f32 sublane count (8); pad B up to a multiple.
    tb = _round_up(min(int(block_b), _round_up(B, 8)), 8)
    b_pad = _round_up(B, tb)
    if b_pad != B:
        x = jnp.pad(x, ((0, b_pad - B), (0, 0)))
    grid = (b_pad // tb,)

    hidden_dims = [int(w.shape[1]) for w in weights[:-1]]

    # Pre-scaled dropout masks (PyTorch training-mode / MC-dropout semantics).
    masks = []
    if use_dropout:
        scale = 1.0 / (1.0 - float(drop_rate))
        for h_dim in hidden_dims:
            key, kd = jax.random.split(key)
            keep = jax.random.bernoulli(kd, 1.0 - float(drop_rate), (b_pad, h_dim))
            masks.append(keep.astype(jnp.float32) * scale)

    def const_spec(shape):
        return pl.BlockSpec(shape, lambda i: (0, 0))

    def row_spec(cols):
        return pl.BlockSpec((tb, cols), lambda i: (i, 0))

    in_specs = [row_spec(n_input)]
    operands = [x]
    for li in range(num_hidden):
        in_specs += [const_spec(weights[li].shape), const_spec(biases[li].shape)]
        operands += [weights[li], biases[li]]
        if use_dropout:
            in_specs.append(row_spec(hidden_dims[li]))
            operands.append(masks[li])
    in_specs += [const_spec(weights[-1].shape), const_spec(biases[-1].shape)]
    operands += [weights[-1], biases[-1]]

    out_specs = row_spec(n_output)

    flops = 2 * b_pad * sum(int(w.shape[0]) * int(w.shape[1]) for w in weights)
    bytes_accessed = 4 * (sum(int(o.size) for o in operands) + b_pad * n_output)
    cost = pl.CostEstimate(flops=flops, transcendentals=2 * b_pad,
                           bytes_accessed=bytes_accessed)

    kernel = _make_mlp_kernel(num_hidden, use_dropout)

    fn = pl.pallas_call(
        kernel,
        out_shape=jax.ShapeDtypeStruct((b_pad, n_output), jnp.float32),
        grid_spec=pltpu.PrefetchScalarGridSpec(
            num_scalar_prefetch=0,
            grid=grid,
            in_specs=in_specs,
            out_specs=out_specs,
        ),
        compiler_params=pltpu.CompilerParams(
            dimension_semantics=("parallel",),
            vmem_limit_bytes=32 * 1024 * 1024,
        ),
        cost_estimate=cost,
    )
    out = fn(*operands)
    return out[:B]


def init_params(key, n_input, hidden_layers, n_output=2):
    """Deterministic nn.Linear-style init: U(-1/sqrt(fan_in), 1/sqrt(fan_in))."""
    dims = [n_input] + list(hidden_layers) + [n_output]
    weights, biases = [], []
    for fan_in, fan_out in zip(dims[:-1], dims[1:]):
        key, kw, kb = jax.random.split(key, 3)
        bound = 1.0 / jnp.sqrt(jnp.float32(fan_in))
        w = jax.random.uniform(kw, (fan_in, fan_out), jnp.float32, -bound, bound)
        b = jax.random.uniform(kb, (1, fan_out), jnp.float32, -bound, bound)
        weights.append(w)
        biases.append(b)
    return weights, biases


if __name__ == "__main__":
    # Small shapes consistent with the module: 2-D input [batch, n_input].
    batch = 8
    n_input = 32
    hidden_layers = [64, 64]
    n_output = 2
    drop_rate = 0.1

    root = jax.random.PRNGKey(0)
    kx, kparams, kdrop = jax.random.split(root, 3)
    x = jax.random.normal(kx, (batch, n_input), dtype=jnp.float32)
    weights, biases = init_params(kparams, n_input, hidden_layers, n_output)

    out = mc_dropnet_forward(x, weights, biases, drop_rate, kdrop)
    out = jax.block_until_ready(out)

    assert out.shape == (batch, n_output)
    assert bool(jnp.all(jnp.isfinite(out)))
    # sigma column comes out of a softplus -> must be positive
    assert bool(jnp.all(out[:, 1] > 0.0))

    print("KERNEL_OK")
</pallas_src>

<mosaic_0001>
module attributes {stable_mosaic.version = 11 : i64} {
  func.func @kernel(%arg0: i32, %arg1: memref<8x32xf32, #tpu.memory_space<vmem>>, %arg2: memref<32x64xf32, #tpu.memory_space<vmem>>, %arg3: memref<1x64xf32, #tpu.memory_space<vmem>>, %arg4: memref<8x64xf32, #tpu.memory_space<vmem>>, %arg5: memref<64x64xf32, #tpu.memory_space<vmem>>, %arg6: memref<1x64xf32, #tpu.memory_space<vmem>>, %arg7: memref<8x64xf32, #tpu.memory_space<vmem>>, %arg8: memref<64x2xf32, #tpu.memory_space<vmem>>, %arg9: memref<1x2xf32, #tpu.memory_space<vmem>>, %arg10: memref<8x2xf32, #tpu.memory_space<vmem>>) attributes {dimension_semantics = [#tpu.dimension_semantics<parallel>], iteration_bounds = array<i64: 1>, scalar_prefetch = 0 : i64, scratch_operands = 0 : i64, tpu.core_type = #tpu.core_type<tc>, window_params = [{transform_indices = @transform_0, window_bounds = array<i64: 8, 32>}, {pipeline_mode = #tpu.pipeline_mode<synchronous>, transform_indices = @transform_1, window_bounds = array<i64: 32, 64>}, {pipeline_mode = #tpu.pipeline_mode<synchronous>, transform_indices = @transform_2, window_bounds = array<i64: 1, 64>}, {transform_indices = @transform_3, window_bounds = array<i64: 8, 64>}, {pipeline_mode = #tpu.pipeline_mode<synchronous>, transform_indices = @transform_4, window_bounds = array<i64: 64, 64>}, {pipeline_mode = #tpu.pipeline_mode<synchronous>, transform_indices = @transform_5, window_bounds = array<i64: 1, 64>}, {transform_indices = @transform_6, window_bounds = array<i64: 8, 64>}, {pipeline_mode = #tpu.pipeline_mode<synchronous>, transform_indices = @transform_7, window_bounds = array<i64: 64, 2>}, {pipeline_mode = #tpu.pipeline_mode<synchronous>, transform_indices = @transform_8, window_bounds = array<i64: 1, 2>}, {transform_indices = @transform_9, window_bounds = array<i64: 8, 2>}]} {
    %c0 = arith.constant 0 : index
    %c0_0 = arith.constant 0 : index
    %0 = vector.load %arg1[%c0, %c0_0] : memref<8x32xf32, #tpu.memory_space<vmem>>, vector<8x32xf32>
    %c0_1 = arith.constant 0 : index
    %c0_2 = arith.constant 0 : index
    %1 = vector.load %arg2[%c0_1, %c0_2] : memref<32x64xf32, #tpu.memory_space<vmem>>, vector<32x64xf32>
    %c0_3 = arith.constant 0 : index
    %c0_4 = arith.constant 0 : index
    %2 = vector.load %arg3[%c0_3, %c0_4] : memref<1x64xf32, #tpu.memory_space<vmem>>, vector<1x64xf32>
    %cst = arith.constant dense<0.000000e+00> : vector<8x64xf32>
    %3 = tpu.matmul %0, %1, %cst {dimension_numbers = #tpu.dot_dimension_numbers<[1], [0], [0], [1], [0, 0, 1, 1], [], []>} : vector<8x32xf32>, vector<32x64xf32>, vector<8x64xf32> -> vector<8x64xf32>
    %4 = vector.broadcast %2 : vector<1x64xf32> to vector<8x64xf32>
    %5 = arith.addf %3, %4 : vector<8x64xf32>
    %cst_5 = arith.constant 2.000000e-01 : f32
    %6 = vector.broadcast %cst_5 : f32 to vector<8x64xf32>
    %7 = arith.mulf %6, %5 : vector<8x64xf32>
    %8 = arith.maximumf %5, %7 : vector<8x64xf32>
    %c0_6 = arith.constant 0 : index
    %c0_7 = arith.constant 0 : index
    %9 = vector.load %arg4[%c0_6, %c0_7] : memref<8x64xf32, #tpu.memory_space<vmem>>, vector<8x64xf32>
    %10 = arith.mulf %8, %9 : vector<8x64xf32>
    %c0_8 = arith.constant 0 : index
    %c0_9 = arith.constant 0 : index
    %11 = vector.load %arg5[%c0_8, %c0_9] : memref<64x64xf32, #tpu.memory_space<vmem>>, vector<64x64xf32>
    %c0_10 = arith.constant 0 : index
    %c0_11 = arith.constant 0 : index
    %12 = vector.load %arg6[%c0_10, %c0_11] : memref<1x64xf32, #tpu.memory_space<vmem>>, vector<1x64xf32>
    %cst_12 = arith.constant dense<0.000000e+00> : vector<8x64xf32>
    %13 = tpu.matmul %10, %11, %cst_12 {dimension_numbers = #tpu.dot_dimension_numbers<[1], [0], [0], [1], [0, 0, 1, 1], [], []>} : vector<8x64xf32>, vector<64x64xf32>, vector<8x64xf32> -> vector<8x64xf32>
    %14 = vector.broadcast %12 : vector<1x64xf32> to vector<8x64xf32>
    %15 = arith.addf %13, %14 : vector<8x64xf32>
    %cst_13 = arith.constant 2.000000e-01 : f32
    %16 = vector.broadcast %cst_13 : f32 to vector<8x64xf32>
    %17 = arith.mulf %16, %15 : vector<8x64xf32>
    %18 = arith.maximumf %15, %17 : vector<8x64xf32>
    %c0_14 = arith.constant 0 : index
    %c0_15 = arith.constant 0 : index
    %19 = vector.load %arg7[%c0_14, %c0_15] : memref<8x64xf32, #tpu.memory_space<vmem>>, vector<8x64xf32>
    %20 = arith.mulf %18, %19 : vector<8x64xf32>
    %c0_16 = arith.constant 0 : index
    %c0_17 = arith.constant 0 : index
    %21 = vector.load %arg8[%c0_16, %c0_17] : memref<64x2xf32, #tpu.memory_space<vmem>>, vector<64x2xf32>
    %c0_18 = arith.constant 0 : index
    %c0_19 = arith.constant 0 : index
    %22 = vector.load %arg9[%c0_18, %c0_19] : memref<1x2xf32, #tpu.memory_space<vmem>>, vector<1x2xf32>
    %cst_20 = arith.constant dense<0.000000e+00> : vector<8x2xf32>
    %23 = tpu.matmul %20, %21, %cst_20 {dimension_numbers = #tpu.dot_dimension_numbers<[1], [0], [0], [1], [0, 0, 1, 1], [], []>} : vector<8x64xf32>, vector<64x2xf32>, vector<8x2xf32> -> vector<8x2xf32>
    %24 = vector.broadcast %22 : vector<1x2xf32> to vector<8x2xf32>
    %25 = arith.addf %23, %24 : vector<8x2xf32>
    %cst_21 = arith.constant 2.000000e+01 : f32
    %26 = vector.broadcast %cst_21 : f32 to vector<8x2xf32>
    %27 = arith.cmpf ogt, %25, %26 : vector<8x2xf32>
    %cst_22 = arith.constant 2.000000e+01 : f32
    %28 = vector.broadcast %cst_22 : f32 to vector<8x2xf32>
    %29 = arith.minimumf %25, %28 : vector<8x2xf32>
    %30 = math.exp %29 : vector<8x2xf32>
    %31 = math.log1p %30 : vector<8x2xf32>
    %32 = arith.select %27, %25, %31 : vector<8x2xi1>, vector<8x2xf32>
    %33 = tpu.iota {dimensions = array<i32: 1>} : vector<8x2xi32>
    %c0_i32 = arith.constant 0 : i32
    %34 = vector.broadcast %c0_i32 : i32 to vector<8x2xi32>
    %35 = arith.cmpi eq, %33, %34 : vector<8x2xi32>
    %36 = arith.select %35, %25, %32 : vector<8x2xi1>, vector<8x2xf32>
    %c0_23 = arith.constant 0 : index
    %c0_24 = arith.constant 0 : index
    %37 = vector.load %arg10[%c0_23, %c0_24] : memref<8x2xf32, #tpu.memory_space<vmem>>, vector<8x2xf32>
    tpu.vector_store %arg10[%c0_23, %c0_24], %36 {strides = array<i32>} : memref<8x2xf32, #tpu.memory_space<vmem>>, vector<8x2xf32>,
    return
  }
  func.func @transform_0(%arg0: i32) -> (i32, i32) {
    %c0_i32 = arith.constant 0 : i32
    %c0_i32_0 = arith.constant 0 : i32
    return %arg0, %c0_i32 : i32, i32
  }
  func.func @transform_1(%arg0: i32) -> (i32, i32) {
    %c0_i32 = arith.constant 0 : i32
    %c0_i32_0 = arith.constant 0 : i32
    %c0_i32_1 = arith.constant 0 : i32
    return %c0_i32, %c0_i32_0 : i32, i32
  }
  func.func @transform_2(%arg0: i32) -> (i32, i32) {
    %c0_i32 = arith.constant 0 : i32
    %c0_i32_0 = arith.constant 0 : i32
    %c0_i32_1 = arith.constant 0 : i32
    return %c0_i32, %c0_i32_0 : i32, i32
  }
  func.func @transform_3(%arg0: i32) -> (i32, i32) {
    %c0_i32 = arith.constant 0 : i32
    %c0_i32_0 = arith.constant 0 : i32
    return %arg0, %c0_i32 : i32, i32
  }
  func.func @transform_4(%arg0: i32) -> (i32, i32) {
    %c0_i32 = arith.constant 0 : i32
    %c0_i32_0 = arith.constant 0 : i32
    %c0_i32_1 = arith.constant 0 : i32
    return %c0_i32, %c0_i32_0 : i32, i32
  }
  func.func @transform_5(%arg0: i32) -> (i32, i32) {
    %c0_i32 = arith.constant 0 : i32
    %c0_i32_0 = arith.constant 0 : i32
    %c0_i32_1 = arith.constant 0 : i32
    return %c0_i32, %c0_i32_0 : i32, i32
  }
  func.func @transform_6(%arg0: i32) -> (i32, i32) {
    %c0_i32 = arith.constant 0 : i32
    %c0_i32_0 = arith.constant 0 : i32
    return %arg0, %c0_i32 : i32, i32
  }
  func.func @transform_7(%arg0: i32) -> (i32, i32) {
    %c0_i32 = arith.constant 0 : i32
    %c0_i32_0 = arith.constant 0 : i32
    %c0_i32_1 = arith.constant 0 : i32
    return %c0_i32, %c0_i32_0 : i32, i32
  }
  func.func @transform_8(%arg0: i32) -> (i32, i32) {
    %c0_i32 = arith.constant 0 : i32
    %c0_i32_0 = arith.constant 0 : i32
    %c0_i32_1 = arith.constant 0 : i32
    return %c0_i32, %c0_i32_0 : i32, i32
  }
  func.func @transform_9(%arg0: i32) -> (i32, i32) {
    %c0_i32 = arith.constant 0 : i32
    %c0_i32_0 = arith.constant 0 : i32
    return %arg0, %c0_i32 : i32, i32
  }
}

</mosaic_0001>

<bundles_post_ra>
// kernel: tpu_custom_call.1
= control target key start
LH: loop header
LB: loop body
LE: loop exit
PB: predicated region body
PF: predicated region fallthrough
CT: control target
= control target key end

     0   :  { %14 = vsyncpa [#allocation3], 0  ;;  %s476_s0 = inlined_call_operand.hbm [shape: f32[8,32], index: 0, kind: input, shape index: {}]   ;;  %s477_s1 = inlined_call_operand.hbm [shape: f32[32,64], index: 1, kind: input, shape index: {}]   ;;  %s478_s2 = inlined_call_operand.vmem [shape: f32[1,64], index: 2, kind: input, shape index: {}]   ;;  %s479_s3 = inlined_call_operand.hbm [shape: f32[8,64], index: 3, kind: input, shape index: {}]   ;;  %s480_s4 = inlined_call_operand.vmem [shape: f32[64,64], index: 4, kind: input, shape index: {}]   ;;  %s481_s5 = inlined_call_operand.vmem [shape: f32[1,64], index: 5, kind: input, shape index: {}]   ;;  %s482_s6 = inlined_call_operand.hbm [shape: f32[8,64], index: 6, kind: input, shape index: {}]   ;;  %s483_s7 = inlined_call_operand.vmem [shape: f32[64,2], index: 7, kind: input, shape index: {}]   ;;  %s484_s8 = inlined_call_operand.vmem [shape: f32[1,2], index: 8, kind: input, shape index: {}]   ;;  %s485_s9 = inlined_call_operand.vmem [shape: f32[8,2], index: 9, kind: output, shape index: {}]  }
   0x1   :  { %15 = vsyncpa [#allocation5], 0  ;;  %s32_s11 = sshll.u32 %s477_s1, 4  ;;  %s33_s11 = int_to_ptr.hbm [resolvable:$true] %s32_s11 }
   0x2   :  { %16 = vsyncpa [#allocation8], 0  ;;  %s346_s12 = smov [#allocation4]   ;;  %s22_s16 = sshll.u32 %s476_s0, 4  ;;  %s23_s16 = int_to_ptr.hbm [resolvable:$true] %s22_s16 }
   0x3   :  { %s34_s13 = sshll.u32 %s346_s12, 4  ;;  %s347_s17 = smov 128   ;;  %s35_s13 = int_to_ptr.vmem [resolvable:$true] %s34_s13 }
   0x4   :  { %s348_s18 = smov 8   ;;  %s349_s19 = smov [#allocation2]  }
   0x5   :  { %40 = dma.hbm_to_vmem [thread:$0]  %s33_s11, 512, %s35_s13, [#allocation5], %s347_s17, %s347_s17, %s348_s18  }
   0x6   :  { %s24_s20 = sshll.u32 %s349_s19, 4  ;;  %s48_s23 = sshll.u32 %s479_s3, 4  ;;  %s25_s20 = int_to_ptr.vmem [resolvable:$true] %s24_s20  ;;  %s49_s23 = int_to_ptr.hbm [resolvable:$true] %s48_s23 }
   0x7   :  { %27 = dma.hbm_to_vmem [thread:$0]  %s23_s16, 128, %s25_s20, [#allocation3]  }
   0x8   :  { %s63_s25 = sshll.u32 %s482_s6, 4  ;;  %s350_s26 = smov [#allocation6]   ;;  %s64_s25 = int_to_ptr.hbm [resolvable:$true] %s63_s25 }
   0x9   :  { %s50_s27 = sshll.u32 %s350_s26, 4  ;;  %s351_s0 = smov [#allocation7]   ;;  %s51_s27 = int_to_ptr.vmem [resolvable:$true] %s50_s27 }
   0xa   :  { %53 = dma.hbm_to_vmem [thread:$0]  %s49_s23, 128, %s51_s27, [#allocation5]  }
   0xb   :  { %s65_s28 = sshll.u32 %s351_s0, 4  ;;  %s66_s28 = int_to_ptr.vmem [resolvable:$true] %s65_s28 }
   0xc   :  { %68 = dma.hbm_to_vmem [thread:$0]  %s64_s25, 128, %s66_s28, [#allocation8]  }
   0xd   :  { %340 = dma.done.wait [#allocation3], 128  }
   0xe   :  { %341 = vsyncadd [#allocation3], 4294967168 }
   0xf   :  { %342 = dma.done.wait [#allocation5], 640  }
  0x10   :  { %343 = vsyncadd [#allocation5], 4294966656 }
  0x11   :  { %344 = dma.done.wait [#allocation8], 128  }
  0x12   :  { %345 = vsyncadd [#allocation8], 4294967168  ;;  %v93_v0 = vld [vmem:[#allocation4 + $0x18] sm:$0xff]  ;;  %v92_v1 = vld [vmem:[#allocation4 + $0x10] sm:$0xff]  ;;  %vm98_vm0 = vcmask 261120   ;;  %vm138_vm1 = vcmask 523264   ;;  %v215_v43 = vlaneseq }
  0x13   :  { %114 = vmatpush.msra.mxu0 %v93_v0  ;;  %v133_v2 = vld [vmem:[%s480_s4 + $0x38] sm:$0xff]  ;;  %v91_v3 = vld [vmem:[#allocation4 + $0x8] sm:$0xff]  ;;  %v131_v5 = vld [vmem:[%s480_s4 + $0x28] sm:$0xff]  ;;  %vm219_vm5 = vcmask 15360  }
  0x14   :  { %150 = vmatpush.msra.mxu1 %v133_v2  ;;  %v132_v4 = vld [vmem:[%s480_s4 + $0x30] sm:$0xff]  ;;  %v90_v6 = vld [vmem:[#allocation4] sm:$0xff]  ;;  %v89_v7 = vld [vmem:[#allocation2] sm:$0xff]  ;;  %v216_v46 = vand.u32 127, %v215_v43 }
  0x15   :  { %115 = vmatpush.msra.mxu0 %v92_v1  ;;  %v130_v8 = vld [vmem:[%s480_s4 + $0x20] sm:$0xff]  ;;  %v129_v9 = vld [vmem:[%s480_s4 + $0x18] sm:$0xff]  ;;  %v128_v10 = vld [vmem:[%s480_s4 + $0x10] sm:$0xff] }
  0x16   :  { %151 = vmatpush.msra.mxu1 %v132_v4  ;;  %v127_v11 = vld [vmem:[%s480_s4 + $0x8] sm:$0xff]  ;;  %v126_v12 = vld [vmem:[%s480_s4] sm:$0xff]  ;;  %v173_v13 = vld [vmem:[%s483_s7 + $0x38] sm:$0xff]  ;;  %vm217_vm3 = vcmp.eq.s32.totalorder %v216_v46, 0 }
  0x17   :  { %116 = vmatpush.msra.mxu0 %v91_v3  ;;  %v172_v14 = vld [vmem:[%s483_s7 + $0x30] sm:$0xff]  ;;  %189 = vmatpush.msra.mxu2 %v173_v13  ;;  %v171_v15 = vld [vmem:[%s483_s7 + $0x28] sm:$0xff]  ;;  %v237_v16 = vld [vmem:[%s478_s2] ss:$0 sm:$0xff] }
  0x18   :  { %152 = vmatpush.msra.mxu1 %v131_v5  ;;  %v124_v20 = vld [vmem:[#allocation6] sm:$0xff]  ;;  %v170_v23 = vld [vmem:[%s483_s7 + $0x20] sm:$0xff]  ;;  %v169_v24 = vld [vmem:[%s483_s7 + $0x18] sm:$0xff] }
  0x19   :  { %117 = vmatpush.msra.mxu0 %v90_v6  ;;  %190 = vmatpush.msra.mxu2 %v172_v14  ;;  %v168_v25 = vld [vmem:[%s483_s7 + $0x10] sm:$0xff]  ;;  %v167_v26 = vld [vmem:[%s483_s7 + $0x8] sm:$0xff]  ;;  %v166_v27 = vld [vmem:[%s483_s7] sm:$0xff] }
  0x1a   :  { %228 = vmatmul.msk.f32.vlgmr.msra.gmra.mxu0 %vm98_vm0, %v89_v7  ;;  %153 = vmatpush.msra.mxu1 %v130_v8  ;;  %v238_v28 = vld [vmem:[%s481_s5] ss:$0 sm:$0xff]  ;;  %v164_v32 = vld [vmem:[#allocation7] sm:$0xff] }
  0x1b   :  { %191 = vmatpush.msra.mxu2 %v171_v15  ;;  %v239_v35 = vld [vmem:[%s484_s8] ss:$0 sm:$0xff] }
  0x1c   :  { %154 = vmatpush.msra.mxu1 %v129_v9 }
  0x1d   :  { %192 = vmatpush.msra.mxu2 %v170_v23 }
  0x1e   :  { %155 = vmatpush.msra.mxu1 %v128_v10 }
  0x1f   :  { %193 = vmatpush.msra.mxu2 %v169_v24 }
  0x20   :  { %156 = vmatpush.msra.mxu1 %v127_v11 }
  0x21   :  { %194 = vmatpush.msra.mxu2 %v168_v25 }
  0x22   :  { %157 = vmatpush.msra.mxu1 %v126_v12 }
  0x23   :  { %195 = vmatpush.msra.mxu2 %v167_v26 }
  0x25   :  { %196 = vmatpush.msra.mxu2 %v166_v27 }
  0x97   :  { %v119_v17 = vpop.f32.mrf.mxu0 }
  0x98   :  { %v120_v18 = vadd.f32 %v237_v16, %v119_v17 }
  0x9a   :  { %v122_v19 = vmul.f32 0.2, %v120_v18 }
  0x9c   :  { %v123_v21 = vmax.f32 %v120_v18, %v122_v19 }
  0x9e   :  { %v125_v22 = vmul.f32 %v124_v20, %v123_v21 }
  0xa0   :  { %229 = vmatmul.msk.f32.vlgmr.msra.gmra.mxu1 %vm138_vm1, %v125_v22 }
 0x11d   :  { %v159_v29 = vpop.f32.mrf.mxu1 }
 0x11e   :  { %v160_v30 = vadd.f32 %v238_v28, %v159_v29 }
 0x120   :  { %v162_v31 = vmul.f32 0.2, %v160_v30 }
 0x122   :  { %v163_v33 = vmax.f32 %v160_v30, %v162_v31 }
 0x124   :  { %v165_v34 = vmul.f32 %v164_v32, %v163_v33 }
 0x126   :  { %230 = vmatmul.msk.f32.vlgmr.msra.gmra.mxu2 %vm138_vm1, %v165_v34 }
 0x1a9   :  { %v198_v36 = vpop.f32.mrf.mxu2 }
 0x1aa   :  { %v199_v37 = vadd.f32 %v239_v35, %v198_v36 }
 0x1ac   :  { %v202_v38 = vmin.f32 %v199_v37, 20.0  ;;  %vm201_vm4 = vcmp.gt.f32.partialorder %v199_v37, 20.0 }
 0x1ae   :  { %v203_v39 = vmul.f32 1.442695, %v202_v38 }
 0x1b0   :  { %240 = vpow2.f32 %v203_v39 }
 0x1b6   :  { %v241_v40 = vpop.eup %240 }
 0x1b7   :  { %v205_v41 = vadd.f32 1.0, %v241_v40  ;;  %v208_v42 = vmul.f32 -0.5, %v241_v40  ;;  %v211_v45 = vand.u32 2147483647, %v241_v40 }
 0x1b9   :  { %242 = vlog2.f32 %v205_v41  ;;  %v209_v44 = vadd.f32 1.0, %v208_v42  ;;  %vm212_vm2 = vcmp.lt.f32.partialorder %v211_v45, 0.0004427343 }
 0x1bb   :  { %v210_v49 = vmul.f32 %v241_v40, %v209_v44 }
 0x1bf   :  { %v243_v47 = vpop.eup %242 }
 0x1c0   :  { %v207_v48 = vmul.f32 0.6931472, %v243_v47 }
 0x1c2   :  { %v213_v50 = vsel %vm212_vm2, %v210_v49, %v207_v48 }
 0x1c3   :  { %v214_v51 = vsel %vm201_vm4, %v199_v37, %v213_v50 }
 0x1c4   :  { %v218_v52 = vsel %vm217_vm3, %v199_v37, %v214_v51 }
 0x1c5   :  { %220 = vst.msk [vmem:[%s485_s9] sm:$0xff] %vm219_vm5, %v218_v52 }
 0x1c6   :  { %225 = vsyncpa [#allocation3], 1 }
 0x1c7   :  { %226 = vsyncpa [#allocation5], 1 }
 0x1c8   :  { %227 = vsyncpa [#allocation8], 1 }

</bundles_post_ra>
